<compile_context>
chip_gen: v6e
topology: v6e:2x2x1
jax: 0.10.0
libtpu: 0.0.40
codegen_flags: <defaults>
</compile_context>

<pallas_src>
import functools

import jax
import jax.numpy as jnp
from jax.experimental import pallas as pl
from jax.experimental.pallas import tpu as pltpu

_NUM_SPLITS = 2            # leading "parallel" grid axis (both TCs on v7x)
_OUT_SUB, _OUT_LANE = 8, 128   # aligned per-split partial-sum slab


def _round_up(a, m):
    return ((a + m - 1) // m) * m


def center_loss_kernel(x_ref, labels_ref, centers_ref, loss_ref, *,
                       true_b, tile_b, tiles_per_split):
    """x_ref:       (tile_b, D) VMEM tile of features
       labels_ref:  (tile_b, 1) int32 VMEM tile of labels
       centers_ref: (C, D) VMEM-resident centers (constant index_map)
       loss_ref:    (8, 128) f32 resident partial-sum slab for this split
    """
    s = pl.program_id(0)          # split (core) index      -- "parallel"
    i = pl.program_id(1)          # batch tile within split -- "arbitrary"

    @pl.when(i == 0)
    def _():
        loss_ref[...] = jnp.zeros_like(loss_ref)

    # One-hot gather of the label-selected center rows on the MXU.  The 0/1
    # weights make the matmul an exact row select.
    labels = labels_ref[...]                                     # (tile_b, 1)
    num_classes = centers_ref.shape[0]
    class_ids = jax.lax.broadcasted_iota(jnp.int32, (tile_b, num_classes), 1)
    onehot = (labels == class_ids).astype(centers_ref.dtype)     # (tile_b, C)
    gathered = jnp.dot(onehot, centers_ref[...],
                       preferred_element_type=jnp.float32)       # (tile_b, D)

    # Per-row squared distance (VPU + XLU reduction), clamp as in torch.
    x = x_ref[...].astype(jnp.float32)
    diff = x - gathered
    d2 = jnp.sum(diff * diff, axis=1, keepdims=True)             # (tile_b, 1)
    d2 = jnp.clip(d2, 1e-12, 1e12)

    # Mask batch-padding rows before accumulating.
    row0 = (s * tiles_per_split + i) * tile_b
    rows = row0 + jax.lax.broadcasted_iota(jnp.int32, d2.shape, 0)
    d2 = jnp.where(rows < true_b, d2, 0.0)

    # Resident per-split accumulator: scalar partial sum broadcast over the
    # aligned (8, 128) output slab.
    loss_ref[...] = loss_ref[...] + jnp.sum(d2)


def center_loss(x, centers, labels, *, tile_b=256):
    """x: (B, D) float, centers: (C, D) float, labels: (B,) int -> scalar f32."""
    B, D = x.shape
    C, D2 = centers.shape
    assert D == D2, "feature dims of x and centers must match"
    assert B == labels.shape[0], "features.size(0) is not equal to labels.size(0)"
    assert B > 0, "empty batch"

    # Sublane-friendly batch tile (8 for f32, 16 for bf16, 32 for 8-bit); no
    # larger than needed for tiny batches, 256 by default for realistic ones.
    sub = max(8, 32 // jnp.dtype(x.dtype).itemsize)
    tile_b = _round_up(max(sub, min(tile_b, _round_up(B, sub))), sub)

    tiles_per_split = pl.cdiv(pl.cdiv(B, tile_b), _NUM_SPLITS)
    padded_b = _NUM_SPLITS * tiles_per_split * tile_b

    labels = labels.astype(jnp.int32).reshape(B, 1)
    if padded_b != B:
        x = jnp.pad(x, ((0, padded_b - B), (0, 0)))
        labels = jnp.pad(labels, ((0, padded_b - B), (0, 0)))

    centers_bytes = C * D * jnp.dtype(centers.dtype).itemsize
    # TODO(synk): add an HBM double-buffered row-gather fallback for centers
    # tables that exceed the VMEM-resident budget (~24 MiB cap for v7x).
    assert centers_bytes <= 24 * 1024 * 1024, "centers too large for VMEM-resident path"

    vmem_estimate = (2 * centers_bytes
                     + 2 * tile_b * D * jnp.dtype(x.dtype).itemsize
                     + 2 * tile_b * 4
                     + 2 * _NUM_SPLITS * _OUT_SUB * _OUT_LANE * 4)
    vmem_limit = None
    if vmem_estimate > 32 * 1024 * 1024:
        vmem_limit = int(min(vmem_estimate + (8 << 20), 48 * 1024 * 1024))

    kernel = functools.partial(center_loss_kernel, true_b=B, tile_b=tile_b,
                               tiles_per_split=tiles_per_split)

    out = pl.pallas_call(
        kernel,
        out_shape=jax.ShapeDtypeStruct((_NUM_SPLITS * _OUT_SUB, _OUT_LANE),
                                       jnp.float32),
        grid=(_NUM_SPLITS, tiles_per_split),
        in_specs=[
            pl.BlockSpec((tile_b, D), lambda s, i: (s * tiles_per_split + i, 0)),
            pl.BlockSpec((tile_b, 1), lambda s, i: (s * tiles_per_split + i, 0)),
            pl.BlockSpec((C, D), lambda s, i: (0, 0)),     # resident centers
        ],
        out_specs=pl.BlockSpec((_OUT_SUB, _OUT_LANE), lambda s, i: (s, 0)),
        compiler_params=pltpu.CompilerParams(
            dimension_semantics=("parallel", "arbitrary"),
            vmem_limit_bytes=vmem_limit),
    )(x, labels, centers)

    partial_sums = out[::_OUT_SUB, 0]            # one partial sum per split
    return jnp.sum(partial_sums) / jnp.float32(B)


if __name__ == "__main__":
    # Small deterministic shapes consistent with the module's forward:
    # batch=12 (exercises batch padding + the 2-way split), feat_dim=128,
    # num_classes=32.
    B, D, C = 12, 128, 32
    key = jax.random.PRNGKey(0)
    kx, kc, kl = jax.random.split(key, 3)

    x = jax.random.normal(kx, (B, D), dtype=jnp.float32)
    centers = jax.random.normal(kc, (C, D), dtype=jnp.float32)  # nn.Parameter(torch.randn(C, D))
    labels = jax.random.randint(kl, (B,), 0, C, dtype=jnp.int32)

    loss = center_loss(x, centers, labels)
    jax.block_until_ready(loss)

    # Pure-JAX reference (same math as the torch forward: the masked distmat
    # entry per row is exactly ||x_i - c_{y_i}||^2, clamped then averaged).
    gathered = centers[labels]
    ref = jnp.mean(jnp.clip(jnp.sum((x - gathered) ** 2, axis=1), 1e-12, 1e12))
    assert jnp.allclose(loss, ref, rtol=1e-5, atol=1e-4), (loss, ref)

    print("KERNEL_OK")
</pallas_src>

<mosaic_0001>
module attributes {stable_mosaic.version = 11 : i64} {
  func.func @center_loss_kernel(%arg0: i32, %arg1: i32, %arg2: memref<16x128xf32, #tpu.memory_space<vmem>>, %arg3: memref<16x1xi32, #tpu.memory_space<vmem>>, %arg4: memref<32x128xf32, #tpu.memory_space<vmem>>, %arg5: memref<8x128xf32, #tpu.memory_space<vmem>>) attributes {dimension_semantics = [#tpu.dimension_semantics<parallel>, #tpu.dimension_semantics<arbitrary>], iteration_bounds = array<i64: 2, 1>, scalar_prefetch = 0 : i64, scratch_operands = 0 : i64, tpu.core_type = #tpu.core_type<tc>, window_params = [{transform_indices = @transform_0, window_bounds = array<i64: 16, 128>}, {transform_indices = @transform_1, window_bounds = array<i64: 16, 1>}, {pipeline_mode = #tpu.pipeline_mode<synchronous>, transform_indices = @transform_2, window_bounds = array<i64: 32, 128>}, {transform_indices = @transform_3, window_bounds = array<i64: 8, 128>}]} {
    %c0_i32 = arith.constant 0 : i32
    %0 = arith.cmpi eq, %arg1, %c0_i32 : i32
    %1 = arith.extui %0 : i1 to i32
    %c0_i32_0 = arith.constant 0 : i32
    %2 = arith.cmpi ne, %1, %c0_i32_0 : i32
    scf.if %2 {
      %cst_15 = arith.constant 0.000000e+00 : f32
      %38 = vector.broadcast %cst_15 : f32 to vector<8x128xf32>
      %c0_16 = arith.constant 0 : index
      %c0_17 = arith.constant 0 : index
      %39 = vector.load %arg5[%c0_16, %c0_17] : memref<8x128xf32, #tpu.memory_space<vmem>>, vector<8x128xf32>
      tpu.vector_store %arg5[%c0_16, %c0_17], %38 {strides = array<i32>} : memref<8x128xf32, #tpu.memory_space<vmem>>, vector<8x128xf32>,
    } else {
    }
    %c0 = arith.constant 0 : index
    %c0_1 = arith.constant 0 : index
    %3 = vector.load %arg3[%c0, %c0_1] : memref<16x1xi32, #tpu.memory_space<vmem>>, vector<16x1xi32>
    %4 = tpu.iota {dimensions = array<i32: 1>} : vector<16x32xi32>
    %5 = vector.broadcast %3 : vector<16x1xi32> to vector<16x32xi32>
    %6 = arith.cmpi eq, %5, %4 : vector<16x32xi32>
    %7 = arith.extui %6 : vector<16x32xi1> to vector<16x32xi32>
    %8 = arith.sitofp %7 : vector<16x32xi32> to vector<16x32xf32>
    %c0_2 = arith.constant 0 : index
    %c0_3 = arith.constant 0 : index
    %9 = vector.load %arg4[%c0_2, %c0_3] : memref<32x128xf32, #tpu.memory_space<vmem>>, vector<32x128xf32>
    %cst = arith.constant dense<0.000000e+00> : vector<16x128xf32>
    %10 = tpu.matmul %8, %9, %cst {dimension_numbers = #tpu.dot_dimension_numbers<[1], [0], [0], [1], [0, 0, 1, 1], [], []>} : vector<16x32xf32>, vector<32x128xf32>, vector<16x128xf32> -> vector<16x128xf32>
    %c0_4 = arith.constant 0 : index
    %c0_5 = arith.constant 0 : index
    %11 = vector.load %arg2[%c0_4, %c0_5] : memref<16x128xf32, #tpu.memory_space<vmem>>, vector<16x128xf32>
    %12 = arith.subf %11, %10 : vector<16x128xf32>
    %13 = arith.mulf %12, %12 : vector<16x128xf32>
    %cst_6 = arith.constant dense<0.000000e+00> : vector<16xf32>
    %14 = vector.multi_reduction <add>, %13, %cst_6 [1] : vector<16x128xf32> to vector<16xf32>
    %15 = vector.shape_cast %14 : vector<16xf32> to vector<16x1xf32>
    %cst_7 = arith.constant 9.99999996E-13 : f32
    %cst_8 = arith.constant 9.99999995E+11 : f32
    %16 = vector.broadcast %cst_7 : f32 to vector<16x1xf32>
    %17 = arith.maximumf %16, %15 : vector<16x1xf32>
    %18 = vector.broadcast %cst_8 : f32 to vector<16x1xf32>
    %19 = arith.minimumf %18, %17 : vector<16x1xf32>
    %c1_i32 = arith.constant 1 : i32
    %20 = arith.muli %arg0, %c1_i32 : i32
    %21 = arith.addi %20, %arg1 : i32
    %c16_i32 = arith.constant 16 : i32
    %22 = arith.muli %21, %c16_i32 : i32
    %23 = tpu.iota {dimensions = array<i32: 0>} : vector<16x1xi32>
    %24 = vector.broadcast %22 : i32 to vector<16x1xi32>
    %25 = arith.addi %24, %23 : vector<16x1xi32>
    %c12_i32 = arith.constant 12 : i32
    %26 = vector.broadcast %c12_i32 : i32 to vector<16x1xi32>
    %27 = arith.cmpi slt, %25, %26 : vector<16x1xi32>
    %cst_9 = arith.constant 0.000000e+00 : f32
    %28 = vector.broadcast %cst_9 : f32 to vector<16x1xf32>
    %29 = arith.select %27, %19, %28 : vector<16x1xi1>, vector<16x1xf32>
    %c0_10 = arith.constant 0 : index
    %c0_11 = arith.constant 0 : index
    %30 = vector.load %arg5[%c0_10, %c0_11] : memref<8x128xf32, #tpu.memory_space<vmem>>, vector<8x128xf32>
    %31 = vector.shape_cast %29 : vector<16x1xf32> to vector<1x16x1xf32>
    %cst_12 = arith.constant dense<0.000000e+00> : vector<1xf32>
    %32 = vector.multi_reduction <add>, %31, %cst_12 [1, 2] : vector<1x16x1xf32> to vector<1xf32>
    %33 = vector.shape_cast %32 : vector<1xf32> to vector<1x1x1xf32>
    %34 = vector.extract %33[0, 0, 0] : f32 from vector<1x1x1xf32>
    %35 = vector.broadcast %34 : f32 to vector<8x128xf32>
    %36 = arith.addf %30, %35 : vector<8x128xf32>
    %c0_13 = arith.constant 0 : index
    %c0_14 = arith.constant 0 : index
    %37 = vector.load %arg5[%c0_13, %c0_14] : memref<8x128xf32, #tpu.memory_space<vmem>>, vector<8x128xf32>
    tpu.vector_store %arg5[%c0_13, %c0_14], %36 {strides = array<i32>} : memref<8x128xf32, #tpu.memory_space<vmem>>, vector<8x128xf32>,
    return
  }
  func.func @transform_0(%arg0: i32, %arg1: i32) -> (i32, i32) {
    %c1_i32 = arith.constant 1 : i32
    %0 = arith.muli %arg0, %c1_i32 : i32
    %1 = arith.addi %0, %arg1 : i32
    %c0_i32 = arith.constant 0 : i32
    %c0_i32_0 = arith.constant 0 : i32
    return %1, %c0_i32 : i32, i32
  }
  func.func @transform_1(%arg0: i32, %arg1: i32) -> (i32, i32) {
    %c1_i32 = arith.constant 1 : i32
    %0 = arith.muli %arg0, %c1_i32 : i32
    %1 = arith.addi %0, %arg1 : i32
    %c0_i32 = arith.constant 0 : i32
    %c0_i32_0 = arith.constant 0 : i32
    return %1, %c0_i32 : i32, i32
  }
  func.func @transform_2(%arg0: i32, %arg1: i32) -> (i32, i32) {
    %c0_i32 = arith.constant 0 : i32
    %c0_i32_0 = arith.constant 0 : i32
    %c0_i32_1 = arith.constant 0 : i32
    return %c0_i32, %c0_i32_0 : i32, i32
  }
  func.func @transform_3(%arg0: i32, %arg1: i32) -> (i32, i32) {
    %c0_i32 = arith.constant 0 : i32
    %c0_i32_0 = arith.constant 0 : i32
    return %arg0, %c0_i32 : i32, i32
  }
}

</mosaic_0001>

<bundles_post_ra>
// kernel: tpu_custom_call.1
= control target key start
LH: loop header
LB: loop body
LE: loop exit
PB: predicated region body
PF: predicated region fallthrough
CT: control target
= control target key end

     0   :  { %8 = vsyncpa [#allocation3], 0  ;;  %s864_s0 = inlined_call_operand.vmem [shape: f32[32,128], index: 0, kind: input, shape index: {}]   ;;  %s865_s1 = inlined_call_operand.vmem [shape: s32[32,1], index: 1, kind: input, shape index: {}]   ;;  %s866_s2 = inlined_call_operand.hbm [shape: f32[32,128], index: 2, kind: input, shape index: {}]   ;;  %s867_s3 = inlined_call_operand.hbm [shape: f32[16,128], index: 3, kind: output, shape index: {}]  }
   0x1   :  { %9 = vsyncpa [#allocation4], 0 }
   0x2   :  { %11 = vsyncpa [#allocation4 + $0x1], 0  ;;  %s734_s12 = smov 0   ;;  %s736_s13 = smov 0  }
   0x3   :  { %s738_s14 = smov 0   ;;  %s740_s15 = smov 0  }
   0x4   :  { %s742_s16 = smov 0   ;;  %s744_s17 = smov 0  }
   0x5 LB: > { %s489_s18 = sadd.s32 4294967295, %s706_s17   ;;  %s490_s19 = sadd.s32 4294967294, %s706_s17   ;;  %s706_s17 = sphi %s744_s17, %s17_s17   ;;  %s702_s16 = sphi %s742_s16, %s876_s16   ;;  %s698_s15 = sphi %s740_s15, %s875_s15   ;;  %s694_s14 = sphi %s738_s14, %s874_s14   ;;  %s690_s13 = sphi %s736_s13, %s873_s13   ;;  %s686_s12 = sphi %s734_s12, %s872_s12  }
   0x6   : > { %s29_s20 = sadd.s32 1, %s702_s16  ;;  %s113_s21 = sadd.s32 1, %s694_s14 }
   0x7   : > { %p31_p0 = scmp.ge.s32.totalorder %s29_s20, 2  ;;  %p123_p1 = scmp.ne.s32.totalorder %s694_s14, %s690_s13 }
   0x8   : > { %p124_p2 = scmp.eq.s32.totalorder %s489_s18, 1  ;;  %p129_p3 = scmp.ne.s32.totalorder %s690_s13, %s686_s12 }
   0x9   : > { %s878_s20 = smov (%p31_p0, %s29_s20), 0  ;;  %p130_p5 = scmp.eq.s32.totalorder %s490_s19, 1 }
   0xa   : > { %p774_p4 = por %p124_p2, %p123_p1  ;;  %s110_s23 = ssub.s32 %s702_s16, %s878_s20 }
   0xb   : > { %p491_p6 = scmp.ge.s32.totalorder %s706_s17, 1  ;;  %p111_p7 = scmp.eq.s32.totalorder %s110_s23, 0 }
   0xc   : > { %p781_p8 = por %p130_p5, %p129_p3  ;;  %p137_p9 = scmp.lt.s32.totalorder %s706_s17, 3 }
   0xd   : > { %s787_s25 = scalar_select %p111_p7, %s694_s14, %s113_s21  }
   0xe   : > { %p789_p10 = pnand %p491_p6, %p137_p9  ;;  %p793_p11 = scmp.eq.s32.totalorder %s489_s18, 0 }
   0xf   : > { %s708_s28 = smov [#allocation2]  }
  0x10   : > { %p535_p12 = pneg %p789_p10  ;;  %s149_s29 = sshll.u32 %s708_s28, 4  ;;  %s150_s29 = int_to_ptr.vmem [resolvable:$true] %s149_s29 }
  0x11   : > { %s611_s30 = scalar_lea.vmem %s150_s29, 512  ;;  %p619_p5 = scmp.lt.s32.totalorder %s150_s29, %s150_s29 }
  0x12   : > { %p536_p13 = pnand %p793_p11, %p535_p12  ;;  %p612_p1 = scmp.ne.s32.totalorder %s150_s29, %s611_s30 }
  0x13   : > { %p620_p6 = scmp.lt.s32.totalorder %s611_s30, %s611_s30 }
  0x14   : > { %p602_p0 = pneg %p536_p13 }
  0x15   : > { %p621_p7 = por %p620_p6, %p619_p5 }
  0x16   : > { %p614_p2 = pnand %p612_p1, %p602_p0 }
  0x18   : > { %p615_p3 = pneg %p614_p2 }
  0x1a   : > { %p622_p9 = pnand %p621_p7, %p615_p3 }
  0x1c   : > { %625 = shalt.err (!%p622_p9)
}
  0x1d   : > { %s709_s4 = smov 128   ;;  %s710_s5 = smov 8  }
  0x1e   : > { %538 = dma.hbm_to_vmem [thread:$0]  (!%p536_p13), %s866_s2, 512, %s150_s29, [#allocation3], %s709_s4, %s709_s4, %s710_s5  }
  0x1f   : > { %187 = sbr.rel (%p789_p10) target bundleno = 737 (0x2e1), region = 32 }
  0x24   : > { %677 = dma.done.wait (%p793_p11), [#allocation3], 512  }
  0x25   : > { %679 = vsyncadd (%p793_p11), [#allocation3], 4294966784  ;;  %s497_s8 = sshll.u32 %s698_s15, 1  ;;  %v711_v0 = vmov 0   ;;  %v258_v2 = vld [vmem:[#allocation2 + $0x18] sm:$0xff]  ;;  %v257_v3 = vld [vmem:[#allocation2 + $0x10] sm:$0xff]  ;;  %v241_v7 = vlaneseq }
  0x26   : > { %599 = vset.pattern.permute.xlu0 %v711_v0  ;;  %p220_p12 = scmp.lt.s32.totalorder %s497_s8, 3  ;;  %516 = vmatprep.subr.mxu0 %v258_v2  ;;  %v256_v5 = vld [vmem:[#allocation2 + $0x8] sm:$0xff]  ;;  %v255_v6 = vld [vmem:[#allocation2] sm:$0xff]  ;;  %vm259_vm0 = vcmask 261120   ;;  %v712_v10 = vmov 0.0   ;;  %s505_s26 = sshll.u32 %s698_s15, 4 }
  0x27   : > { %517 = vmatpush3.msra.mxu0 %v258_v2  ;;  %v242_v8 = vand.u32 127, %v241_v7  ;;  %v358_v22 = vshrl.u32 %v241_v7, 7  ;;  %v360_v23 = vstv %s505_s26  ;;  %vm368_vm5 = vcmask 7168   ;;  %s215_s27 = sand.u32 1, %s690_s13   ;;  %s507_s29 = sshll.u32 %s698_s15, 7 }
  0x28   : > { %s880_s8 = smov (!%p220_p12, %s497_s8), 3  ;;  %518 = vmatprep.subr.mxu0 %v257_v3  ;;  %s496_s28 = sshll.u32 %s215_s27, 3 }
  0x29   : > { %s498_s9 = sshll.u32 %s880_s8, 3  ;;  %519 = vmatpush3.msra.mxu0 %v257_v3  ;;  %v359_v24 = vadd.s32 8, %v358_v22  ;;  %v361_v25 = vadd.s32 %v360_v23, %v358_v22  ;;  %s217_s30 = scalar_lea.vmem [#allocation5], %s496_s28 }
  0x2a   : > { %s231_s18 = scalar_lea.vmem %s865_s1, %s498_s9  ;;  %520 = vmatprep.subr.mxu0 %v256_v5  ;;  %s223_s23 = scalar_lea.vmem %s864_s0, %s498_s9 }
  0x2b   : > { %v239_v1 = vld [vmem:[%s231_s18] sm:$0xff]  ;;  %v240_v4 = vld [vmem:[%s231_s18 + $0x8] sm:$0xff]  ;;  %521 = vmatpush3.msra.mxu0 %v256_v5  ;;  %v362_v28 = vadd.s32 %v360_v23, %v359_v24  ;;  %vm363_vm3 = vcmp.lt.s32.totalorder %v361_v25, 12  ;;  %s398_s4 = sshll.u32 %s217_s30, 4  ;;  %s396_s8 = scalar_lea.hbm %s867_s3, %s507_s29  ;;  %s399_s4 = int_to_ptr.vmem [resolvable:$true] %s398_s4 }
  0x2c   : > { %244 = vperm.xlu0 %599, %v239_v1   ;;  %522 = vmatprep.subr.mxu0 %v255_v6  ;;  %v341_v15 = vld [vmem:[%s223_s23] sm:$0xff]  ;;  %v342_v16 = vld [vmem:[%s223_s23 + $0x8] sm:$0xff]  ;;  %s385_s9 = scalar_lea.sflag [#allocation4], %s215_s27  ;;  %s626_s10 = scalar_lea.vmem %s399_s4, 128 }
  0x2d   : > { %523 = vmatpush3.msra.mxu0 %v255_v6  ;;  %vm364_vm4 = vcmp.lt.s32.totalorder %v362_v28, 12  ;;  %p627_p10 = scmp.ne.s32.totalorder %s399_s4, %s626_s10  ;;  %s713_s11 = smov [#allocation5]  }
  0x2e   : > { %s630_s18 = sshll.u32 %s713_s11, 4  ;;  %s631_s18 = int_to_ptr.vmem [resolvable:$false] %s630_s18 }
  0x2f   : > { %p628_p11 = pnand %p627_p10, %p774_p4  ;;  %s632_s15 = scalar_lea.vmem %s631_s18, 256 }
  0x30   : > { %247 = vperm.xlu0 %599, %v240_v4   ;;  %p633_p0 = scmp.lt.s32.totalorder %s399_s4, %s631_s18  ;;  %p634_p1 = scmp.lt.s32.totalorder %s632_s15, %s626_s10 }
  0x31   : > { %p629_p13 = pneg %p628_p11 }
  0x32   : > { %p635_p2 = por %p634_p1, %p633_p0 }
  0x34   : > { %p636_p3 = pnand %p635_p2, %p629_p13 }
  0xa7   : > { %v245_v9 = vpop.permute.xlu0 %244 }
  0xa8   : > { %vm249_vm1 = vcmp.eq.s32.totalorder %v245_v9, %v242_v8 }
  0xa9   : > { %v501_v11 = vsel %vm249_vm1, 1.0, %v712_v10 }
  0xaa   : > { %524 = vmatprep.mubr.msk.f32.mxu0 %vm259_vm0, %v501_v11 }
  0xab   : > { %v248_v12 = vpop.permute.xlu0 %247 }
  0xac   : > { %vm250_vm2 = vcmp.eq.s32.totalorder %v248_v12, %v242_v8 }
  0xad   : > { %v502_v13 = vsel %vm250_vm2, 1.0, %v712_v10 }
  0xae   : > { %525 = vmatmul.mubr.msk.f32.vlgmr.msra.gmra.mxu0 %vm259_vm0, %v502_v13 }
 0x16e   : > { %v526_v14 = vpop.f32.mrf.mxu0 }
 0x16f   : > { %v344_v19 = vsub.f32 %v342_v16, %v526_v14 }
 0x170   : > { %v332_v17 = vpop.f32.mrf.mxu0 }
 0x171   : > { %v343_v18 = vsub.f32 %v341_v15, %v332_v17  ;;  %v346_v21 = vmul.f32 %v344_v19, %v344_v19 }
 0x173   : > { %v345_v20 = vmul.f32 %v343_v18, %v343_v18 }
 0x175   : > { %347 = vadd.xlane.f32.xlu1 %v345_v20 }
 0x179   : > { %349 = vadd.xlane.f32.xlu1 %v346_v21 }
 0x1fe   : > { %v348_v26 = vpop.xlane.xlu1 %347 }
 0x1ff   : > { %v351_v27 = vmax.f32 %v348_v26, 1e-12 }
 0x201   : > { %v353_v29 = vmin.f32 %v351_v27, 1e+12 }
 0x202   : > { %v350_v30 = vpop.xlane.xlu1 %349 }
 0x203   : > { %v352_v31 = vmax.f32 %v350_v30, 1e-12  ;;  %v365_v32 = vsel %vm363_vm3, %v353_v29, 0.0 }
 0x204   : > { %v369_v35 = vsel %vm368_vm5, %v365_v32, 0.0 }
 0x205   : > { %v354_v33 = vmin.f32 %v352_v31, 1e+12 }
 0x207   : > { %v366_v34 = vsel %vm364_vm4, %v354_v33, 0.0 }
 0x208   : > { %v370_v36 = vsel %vm368_vm5, %v366_v34, 0.0 }
 0x209   : > { %v371_v37 = vadd.f32 %v370_v36, %v369_v35 }
 0x20b   : > { %372 = vadd.xlane.f32.xlu0 %v371_v37 }
 0x294   : > { %v373_v38 = vpop.xlane.xlu0 %372 }
 0x295   : > { %v374_v39 = vrot.slane %v373_v38, 4 }
 0x297   : > { %v375_v40 = vadd.f32 %v374_v39, %v373_v38 }
 0x299   : > { %v376_v41 = vrot.slane %v375_v40, 2 }
 0x29b   : > { %v377_v42 = vadd.f32 %v376_v41, %v375_v40 }
 0x29d   : > { %v378_v43 = vrot.slane %v377_v42, 1 }
 0x29f   : > { %v379_v44 = vadd.f32 %v378_v43, %v377_v42 }
 0x2a1   : > { %527 = vpush %v379_v44 }
 0x2d2   : > { %s528_s5 = spop %527 }
 0x2d3   : > { %v381_v45 = vstv %s528_s5 }
 0x2d4   : > { %383 = vst [vmem:[%s217_s30] sm:$0xff] %v381_v45 }
 0x2d5   : > { %639 = shalt.err (!%p636_p3)
}
 0x2d6   : > { %s640_s19 = scalar_lea.hbm %s396_s8, 128  ;;  %s644_s26 = scalar_lea.hbm %s867_s3, 256 }
 0x2d7   : > { %p641_p5 = scmp.ne.s32.totalorder %s396_s8, %s640_s19  ;;  %p645_p9 = scmp.lt.s32.totalorder %s396_s8, %s867_s3 }
 0x2d8   : > { %p646_p12 = scmp.lt.s32.totalorder %s644_s26, %s640_s19 }
 0x2d9   : > { %p642_p6 = pnand %p641_p5, %p774_p4 }
 0x2da   : > { %p647_p10 = por %p646_p12, %p645_p9 }
 0x2db   : > { %p643_p7 = pneg %p642_p6 }
 0x2dd   : > { %p648_p11 = pnand %p647_p10, %p643_p7 }
 0x2df   : > { %651 = shalt.err (!%p648_p11)
}
 0x2e0   : > { %533 = dma.vmem_to_hbm [thread:$0]  (%p774_p4), %s399_s4, 128, %s396_s8, %s385_s9  }
 0x2e1 PF: > { %p545_p13 = scmp.ge.s32.totalorder %s706_s17, 2  ;;  %s410_s29 = sand.u32 1, %s686_s12  }
 0x2e2   : > { %s411_s30 = scalar_lea.sflag [#allocation4], %s410_s29 }
 0x2e3   : > { %p540_p0 = pnand %p545_p13, %p781_p8 }
 0x2e5   : > { %p541_p1 = pneg %p540_p0 }
 0x2e7   : > { %681 = dma.done.wait (%p541_p1), %s411_s30, 128  }
 0x2e8   : > { %683 = vsyncadd (%p541_p1), %s411_s30, 4294967168  ;;  %s17_s17 = sadd.s32 1, %s706_s17   ;;  %s872_s12 = smov %s690_s13 }
 0x2e9   : > { %p14_p2 = scmp.ge.s32.totalorder %s17_s17, 4   ;;  %s873_s13 = smov %s694_s14 }
 0x2ea   : > { %s874_s14 = smov %s787_s25  ;;  %s875_s15 = smov %s702_s16 }
 0x2eb   : > { %s876_s16 = smov %s878_s20  ;;  %16 = sbr.rel (!%p14_p2) target bundleno = 5 (0x5), region = 79 }
 0x2f0   :  { %416 = vsyncpa [#allocation3], 1 }
 0x2f1   :  { %418 = vsyncpa [#allocation3 + $0x1], 1 }
 0x2f2   :  { %419 = vsyncpa [#allocation4], 1 }
 0x2f3   :  { %421 = vsyncpa [#allocation4 + $0x1], 1 }

</bundles_post_ra>
